<compile_context>
chip_gen: v6e
topology: v6e:2x2x1
jax: 0.10.0
libtpu: 0.0.40
codegen_flags: <defaults>
</compile_context>

<pallas_src>
import functools

import jax
import jax.numpy as jnp
from jax.experimental import pallas as pl
from jax.experimental.pallas import tpu as pltpu

_LANE = 128
_SUBLANE = 8


def _round_up(n, m):
    return ((n + m - 1) // m) * m


# ---------------------------------------------------------------------------
# Kernel
# ---------------------------------------------------------------------------
def _lstm_decoder_kernel(x_ref, h0_ref, c0_ref, wg_ref, wo_ref, bg_ref, bo_ref,
                         out_ref, hn_ref, cn_ref,
                         xh_ref, c_ref,
                         *, total_steps, needs_guard):
    """Tc LSTM steps per grid iteration; h/c carried in VMEM scratch.

    Shapes (padded):
      x_ref  : (Tc, Bp, Ip)       per-chunk input block
      h0_ref : (Bp, Hp)           initial hidden   (constant index, Buffered(1))
      c0_ref : (Bp, Hp)           initial cell     (constant index, Buffered(1))
      wg_ref : (Ip+Hp, 4*Hp)      fused [W_ih^T; W_hh^T], gate cols [i, f, o, g]
      wo_ref : (Hp, Op)           head weight W_lin^T
      bg_ref : (1, 4*Hp) f32      b_ih + b_hh, reordered [i, f, o, g]
      bo_ref : (1, Op)   f32      b_lin
      out_ref: (Tc, Bp, Op)       per-chunk output block
      hn_ref : (Bp, Hp)           final hidden state
      cn_ref : (Bp, Hp)           final cell state
      xh_ref : (Bp, Ip+Hp)        scratch: [x_t | h_{t-1}] fused matmul operand
      c_ref  : (Bp, Hp)           scratch: c_{t-1}
    """
    chunk = pl.program_id(0)
    Tc = x_ref.shape[0]
    Bp, Hp = h0_ref.shape
    Ip = x_ref.shape[-1]
    Op = bo_ref.shape[-1]
    mm_dtype = wg_ref.dtype

    @pl.when(chunk == 0)
    def _init():
        xh_ref[:, Ip:] = h0_ref[...]
        c_ref[...] = c0_ref[...]

    # Loop-invariant operands: read/broadcast once, reuse in every unrolled step
    # (JAX does not CSE broadcast_in_dim, so hoist the bias broadcasts here).
    wg = wg_ref[...]
    wo = wo_ref[...]
    bg = jnp.broadcast_to(bg_ref[...], (Bp, 4 * Hp))
    bo = jnp.broadcast_to(bo_ref[...], (Bp, Op))

    base = chunk * Tc

    def step(t, carry):
        def do_step():
            # Stream this step's input into the fused operand (lane-aligned).
            xh_ref[:, :Ip] = x_ref[t]

            # Single fused gate matmul: [x | h] @ Wg -> (Bp, 4*Hp) pre-acts,
            # bf16 operands / f32 accumulate; bias added post-matmul in f32.
            gates = jnp.dot(xh_ref[...].astype(mm_dtype), wg,
                            preferred_element_type=jnp.float32) + bg

            # Gate order along 4*Hp is [i, f, o, g]: one contiguous sigmoid
            # pass, one tanh pass (EUP-friendly, all f32).
            sig = jax.nn.sigmoid(gates[:, :3 * Hp])
            g_g = jnp.tanh(gates[:, 3 * Hp:])
            i_g = sig[:, :Hp]
            f_g = sig[:, Hp:2 * Hp]
            o_g = sig[:, 2 * Hp:3 * Hp]

            c_new = f_g * c_ref[...] + i_g * g_g
            h_new = o_g * jnp.tanh(c_new)

            # Carry state for the next step.
            c_ref[...] = c_new
            xh_ref[:, Ip:] = h_new

            # Linear head; bias added post-matmul in f32.
            out_ref[t] = (jnp.dot(h_new.astype(mm_dtype), wo,
                                  preferred_element_type=jnp.float32)
                          + bo).astype(out_ref.dtype)

        if needs_guard:
            # Only the last chunk can contain padded (invalid) steps; skipping
            # them keeps the carried h/c state exact.
            pl.when(base + t < total_steps)(do_step)
        else:
            do_step()
        return carry

    jax.lax.fori_loop(0, Tc, step, 0, unroll=True)

    @pl.when(chunk == pl.num_programs(0) - 1)
    def _finalize():
        hn_ref[...] = xh_ref[:, Ip:]
        cn_ref[...] = c_ref[...]


# ---------------------------------------------------------------------------
# Weight packing (wrapper side, done once)
# ---------------------------------------------------------------------------
def _pack_weights(params, I, H, O, Ip, Hp, Op, matmul_dtype):
    w_ih_t = params["w_ih"].T.astype(jnp.float32)                  # (I, 4H), cols [i|f|g|o]
    w_hh_t = params["w_hh"].T.astype(jnp.float32)                  # (H, 4H)
    bias = (params["b_ih"] + params["b_hh"]).astype(jnp.float32)   # (4H,)

    Wg = jnp.zeros((Ip + Hp, 4 * Hp), jnp.float32)
    bg = jnp.zeros((1, 4 * Hp), jnp.float32)
    # Reorder PyTorch gate blocks [i, f, g, o] -> [i, f, o, g].
    order = (0, 1, 3, 2)
    for new_g, old_g in enumerate(order):
        col = new_g * Hp
        Wg = Wg.at[:I, col:col + H].set(w_ih_t[:, old_g * H:(old_g + 1) * H])
        Wg = Wg.at[Ip:Ip + H, col:col + H].set(w_hh_t[:, old_g * H:(old_g + 1) * H])
        bg = bg.at[0, col:col + H].set(bias[old_g * H:(old_g + 1) * H])

    Wo = jnp.zeros((Hp, Op), jnp.float32)
    Wo = Wo.at[:H, :O].set(params["w_lin"].T.astype(jnp.float32))
    bo = jnp.zeros((1, Op), jnp.float32)
    bo = bo.at[0, :O].set(params["b_lin"].astype(jnp.float32))

    # Biases stay f32 (added post-matmul on the VPU); only the matmul operands
    # are cast to the (bf16 by default) matmul dtype.
    return Wg.astype(matmul_dtype), Wo.astype(matmul_dtype), bg, bo


def _vmem_limit_bytes(Tc, Bp, Ip, Hp, Op, mm_bytes, out_bytes):
    """Size the scoped VMEM limit from the actual resident footprint."""
    weights = (Ip + Hp) * 4 * Hp * mm_bytes + Hp * Op * mm_bytes   # Buffered(1)
    biases = (4 * Hp + Op) * 4                                     # f32, Buffered(1)
    init_state = 2 * Bp * Hp * 4                                   # h0, c0, Buffered(1)
    x_blocks = 2 * Tc * Bp * Ip * 4                                # double-buffered input chunk
    out_blocks = 2 * Tc * Bp * Op * out_bytes                      # double-buffered output chunk
    state_out = 2 * 2 * Bp * Hp * 4                                # hn, cn outputs
    scratch = Bp * (Ip + Hp) * 4 + Bp * Hp * 4                     # [x|h] operand + c carry
    total = weights + biases + init_state + x_blocks + out_blocks + state_out + scratch
    # 2x + 8 MiB headroom for compiler-internal scratch; capped below physical
    # VMEM of the smallest target we care about sizing for.
    return int(min(2 * total + (8 << 20), 100 * 1024 * 1024))


# ---------------------------------------------------------------------------
# Wrappers
# ---------------------------------------------------------------------------
def lstm_decoder_rollout(x_seq, h0, c0, params, *,
                         matmul_dtype=jnp.bfloat16,
                         out_dtype=jnp.float32,
                         time_chunk=16):
    """Run T decoder steps in one pallas_call (weights stay VMEM resident).

    x_seq: (T, B, input_size); h0/c0: (1, B, hidden_size).
    Returns (out_seq (T, B, O), h_n (1, B, H), c_n (1, B, H)).
    """
    T, B, I = x_seq.shape
    H = params["w_hh"].shape[1]
    O = params["w_lin"].shape[0]

    Bp = _round_up(B, _SUBLANE)
    Ip = _round_up(I, _LANE)
    Hp = _round_up(H, _LANE)
    Op = _round_up(O, _LANE)

    Tc = max(1, min(int(time_chunk), T))
    n_chunks = pl.cdiv(T, Tc)
    Tp = n_chunks * Tc
    needs_guard = (Tp != T)

    Wg, Wo, bg, bo = _pack_weights(params, I, H, O, Ip, Hp, Op, matmul_dtype)

    x_p = jnp.zeros((Tp, Bp, Ip), jnp.float32).at[:T, :B, :I].set(
        x_seq.astype(jnp.float32))
    h_p = jnp.zeros((Bp, Hp), jnp.float32).at[:B, :H].set(
        h0.reshape(B, H).astype(jnp.float32))
    c_p = jnp.zeros((Bp, Hp), jnp.float32).at[:B, :H].set(
        c0.reshape(B, H).astype(jnp.float32))

    kernel = functools.partial(_lstm_decoder_kernel,
                               total_steps=T, needs_guard=needs_guard)

    mm_bytes = jnp.dtype(matmul_dtype).itemsize
    out_bytes = jnp.dtype(out_dtype).itemsize
    vmem_limit = _vmem_limit_bytes(Tc, Bp, Ip, Hp, Op, mm_bytes, out_bytes)

    const2 = lambda t: (0, 0)

    out_seq, h_n, c_n = pl.pallas_call(
        kernel,
        out_shape=(
            jax.ShapeDtypeStruct((Tp, Bp, Op), out_dtype),
            jax.ShapeDtypeStruct((Bp, Hp), jnp.float32),
            jax.ShapeDtypeStruct((Bp, Hp), jnp.float32),
        ),
        grid_spec=pltpu.PrefetchScalarGridSpec(
            num_scalar_prefetch=0,
            grid=(n_chunks,),
            in_specs=[
                pl.BlockSpec((Tc, Bp, Ip), lambda t: (t, 0, 0)),        # x chunk
                pl.BlockSpec((Bp, Hp), const2,
                             pipeline_mode=pl.Buffered(1)),             # h0
                pl.BlockSpec((Bp, Hp), const2,
                             pipeline_mode=pl.Buffered(1)),             # c0
                pl.BlockSpec((Ip + Hp, 4 * Hp), const2,
                             pipeline_mode=pl.Buffered(1)),             # W_gates
                pl.BlockSpec((Hp, Op), const2,
                             pipeline_mode=pl.Buffered(1)),             # W_head
                pl.BlockSpec((1, 4 * Hp), const2,
                             pipeline_mode=pl.Buffered(1)),             # gate bias
                pl.BlockSpec((1, Op), const2,
                             pipeline_mode=pl.Buffered(1)),             # head bias
            ],
            out_specs=(
                pl.BlockSpec((Tc, Bp, Op), lambda t: (t, 0, 0)),        # out chunk
                pl.BlockSpec((Bp, Hp), const2),                         # h_n
                pl.BlockSpec((Bp, Hp), const2),                         # c_n
            ),
            scratch_shapes=[
                pltpu.VMEM((Bp, Ip + Hp), jnp.float32),                 # [x | h]
                pltpu.VMEM((Bp, Hp), jnp.float32),                      # c carry
            ],
        ),
        compiler_params=pltpu.CompilerParams(
            dimension_semantics=("arbitrary",),
            vmem_limit_bytes=vmem_limit),
    )(x_p, h_p, c_p, Wg, Wo, bg, bo)

    out = out_seq[:T, :B, :O]
    return out, h_n[:B, :H].reshape(1, B, H), c_n[:B, :H].reshape(1, B, H)


def lstm_decoder_forward(x, encoder_hidden_states, params, *,
                         matmul_dtype=jnp.bfloat16, out_dtype=jnp.float32):
    """Equivalent of the PyTorch module forward (single decode step)."""
    h0, c0 = encoder_hidden_states
    out_seq, h_n, c_n = lstm_decoder_rollout(
        x[None], h0, c0, params,
        matmul_dtype=matmul_dtype, out_dtype=out_dtype, time_chunk=1)
    return out_seq[0], (h_n, c_n)


# ---------------------------------------------------------------------------
# Pure-JAX references
# ---------------------------------------------------------------------------
def _reference_step(x, h, c, params):
    H = params["w_hh"].shape[1]
    gates = (jnp.dot(x, params["w_ih"].T, precision="highest")
             + jnp.dot(h, params["w_hh"].T, precision="highest")
             + params["b_ih"] + params["b_hh"])
    i = jax.nn.sigmoid(gates[:, 0 * H:1 * H])
    f = jax.nn.sigmoid(gates[:, 1 * H:2 * H])
    g = jnp.tanh(gates[:, 2 * H:3 * H])
    o = jax.nn.sigmoid(gates[:, 3 * H:4 * H])
    c_new = f * c + i * g
    h_new = o * jnp.tanh(c_new)
    out = jnp.dot(h_new, params["w_lin"].T, precision="highest") + params["b_lin"]
    return out, h_new, c_new


def _reference_forward(x, encoder_hidden_states, params):
    h0, c0 = encoder_hidden_states
    B = x.shape[0]
    H = params["w_hh"].shape[1]
    out, h_new, c_new = _reference_step(x, h0.reshape(B, H), c0.reshape(B, H),
                                        params)
    return out, (h_new.reshape(1, B, H), c_new.reshape(1, B, H))


def _reference_rollout(x_seq, h0, c0, params):
    B = x_seq.shape[1]
    H = params["w_hh"].shape[1]
    h = h0.reshape(B, H)
    c = c0.reshape(B, H)
    outs = []
    for t in range(x_seq.shape[0]):
        out, h, c = _reference_step(x_seq[t], h, c, params)
        outs.append(out)
    return jnp.stack(outs), h.reshape(1, B, H), c.reshape(1, B, H)


# ---------------------------------------------------------------------------
# Test
# ---------------------------------------------------------------------------
if __name__ == "__main__":
    batch = 2
    input_size = 16
    hidden_size = 32
    output_size = 16
    seq_len = 8

    key = jax.random.PRNGKey(0)
    keys = jax.random.split(key, 10)

    bound = 1.0 / jnp.sqrt(jnp.float32(hidden_size))
    u = lambda k, shape: jax.random.uniform(
        k, shape, dtype=jnp.float32, minval=-bound, maxval=bound)

    params = {
        "w_ih": u(keys[0], (4 * hidden_size, input_size)),
        "w_hh": u(keys[1], (4 * hidden_size, hidden_size)),
        "b_ih": u(keys[2], (4 * hidden_size,)),
        "b_hh": u(keys[3], (4 * hidden_size,)),
        "w_lin": u(keys[4], (output_size, hidden_size)),
        "b_lin": u(keys[5], (output_size,)),
    }

    x = jax.random.normal(keys[6], (batch, input_size), dtype=jnp.float32)
    h0 = jax.random.normal(keys[7], (1, batch, hidden_size), dtype=jnp.float32)
    c0 = jax.random.normal(keys[8], (1, batch, hidden_size), dtype=jnp.float32)

    # 1) Single-step forward — semantics of the PyTorch module forward.
    #    bf16 matmul operands (f32 accumulate/elementwise) => relaxed tolerance.
    out, (h_n, c_n) = lstm_decoder_forward(x, (h0, c0), params)
    jax.block_until_ready((out, h_n, c_n))

    ref_out, (ref_h, ref_c) = _reference_forward(x, (h0, c0), params)
    assert jnp.allclose(out, ref_out, atol=3e-2, rtol=3e-2)
    assert jnp.allclose(h_n, ref_h, atol=3e-2, rtol=3e-2)
    assert jnp.allclose(c_n, ref_c, atol=3e-2, rtol=3e-2)

    # 2) Multi-step rollout — same kernel, all T steps inside one grid chunk.
    x_seq = jax.random.normal(keys[9], (seq_len, batch, input_size),
                              dtype=jnp.float32)
    out_seq, hT, cT = lstm_decoder_rollout(x_seq, h0, c0, params)
    jax.block_until_ready((out_seq, hT, cT))

    ref_seq, ref_hT, ref_cT = _reference_rollout(x_seq, h0, c0, params)
    assert jnp.allclose(out_seq, ref_seq, atol=5e-2, rtol=5e-2)
    assert jnp.allclose(hT, ref_hT, atol=5e-2, rtol=5e-2)
    assert jnp.allclose(cT, ref_cT, atol=5e-2, rtol=5e-2)

    # 3) Rollout with a chunk size that does not divide T — exercises the
    #    tail-step guard and multi-chunk state carry.
    out_seq3, hT3, cT3 = lstm_decoder_rollout(x_seq, h0, c0, params,
                                              time_chunk=3)
    jax.block_until_ready((out_seq3, hT3, cT3))
    assert jnp.allclose(out_seq3, ref_seq, atol=5e-2, rtol=5e-2)
    assert jnp.allclose(hT3, ref_hT, atol=5e-2, rtol=5e-2)
    assert jnp.allclose(cT3, ref_cT, atol=5e-2, rtol=5e-2)

    print("KERNEL_OK")
</pallas_src>

<mosaic_0001>
module attributes {stable_mosaic.version = 11 : i64} {
  func.func @_lstm_decoder_kernel(%arg0: i32, %arg1: memref<1x8x128xf32, #tpu.memory_space<vmem>>, %arg2: memref<8x128xf32, #tpu.memory_space<vmem>>, %arg3: memref<8x128xf32, #tpu.memory_space<vmem>>, %arg4: memref<256x512xbf16, #tpu.memory_space<vmem>>, %arg5: memref<128x128xbf16, #tpu.memory_space<vmem>>, %arg6: memref<1x512xf32, #tpu.memory_space<vmem>>, %arg7: memref<1x128xf32, #tpu.memory_space<vmem>>, %arg8: memref<1x8x128xf32, #tpu.memory_space<vmem>>, %arg9: memref<8x128xf32, #tpu.memory_space<vmem>>, %arg10: memref<8x128xf32, #tpu.memory_space<vmem>>, %arg11: memref<8x256xf32, #tpu.memory_space<vmem>>, %arg12: memref<8x128xf32, #tpu.memory_space<vmem>>) attributes {dimension_semantics = [#tpu.dimension_semantics<arbitrary>], iteration_bounds = array<i64: 1>, scalar_prefetch = 0 : i64, scratch_operands = 2 : i64, tpu.core_type = #tpu.core_type<tc>, window_params = [{transform_indices = @transform_0, window_bounds = array<i64: 1, 8, 128>}, {pipeline_mode = #tpu.pipeline_mode<synchronous>, transform_indices = @transform_1, window_bounds = array<i64: 8, 128>}, {pipeline_mode = #tpu.pipeline_mode<synchronous>, transform_indices = @transform_2, window_bounds = array<i64: 8, 128>}, {pipeline_mode = #tpu.pipeline_mode<synchronous>, transform_indices = @transform_3, window_bounds = array<i64: 256, 512>}, {pipeline_mode = #tpu.pipeline_mode<synchronous>, transform_indices = @transform_4, window_bounds = array<i64: 128, 128>}, {pipeline_mode = #tpu.pipeline_mode<synchronous>, transform_indices = @transform_5, window_bounds = array<i64: 1, 512>}, {pipeline_mode = #tpu.pipeline_mode<synchronous>, transform_indices = @transform_6, window_bounds = array<i64: 1, 128>}, {transform_indices = @transform_7, window_bounds = array<i64: 1, 8, 128>}, {pipeline_mode = #tpu.pipeline_mode<synchronous>, transform_indices = @transform_8, window_bounds = array<i64: 8, 128>}, {pipeline_mode = #tpu.pipeline_mode<synchronous>, transform_indices = @transform_9, window_bounds = array<i64: 8, 128>}]} {
    %c0_i32 = arith.constant 0 : i32
    %0 = arith.cmpi eq, %arg0, %c0_i32 : i32
    %1 = arith.extui %0 : i1 to i32
    %c0_i32_0 = arith.constant 0 : i32
    %2 = arith.cmpi ne, %1, %c0_i32_0 : i32
    scf.if %2 {
      %c0_26 = arith.constant 0 : index
      %c0_27 = arith.constant 0 : index
      %48 = vector.load %arg2[%c0_26, %c0_27] : memref<8x128xf32, #tpu.memory_space<vmem>>, vector<8x128xf32>
      %c0_28 = arith.constant 0 : index
      %c128_29 = arith.constant 128 : index
      %49 = vector.load %arg11[%c0_28, %c128_29] : memref<8x256xf32, #tpu.memory_space<vmem>>, vector<8x128xf32>
      tpu.vector_store %arg11[%c0_28, %c128_29], %48 {strides = array<i32>} : memref<8x256xf32, #tpu.memory_space<vmem>>, vector<8x128xf32>,
      %c0_30 = arith.constant 0 : index
      %c0_31 = arith.constant 0 : index
      %50 = vector.load %arg3[%c0_30, %c0_31] : memref<8x128xf32, #tpu.memory_space<vmem>>, vector<8x128xf32>
      %c0_32 = arith.constant 0 : index
      %c0_33 = arith.constant 0 : index
      %51 = vector.load %arg12[%c0_32, %c0_33] : memref<8x128xf32, #tpu.memory_space<vmem>>, vector<8x128xf32>
      tpu.vector_store %arg12[%c0_32, %c0_33], %50 {strides = array<i32>} : memref<8x128xf32, #tpu.memory_space<vmem>>, vector<8x128xf32>,
    } else {
    }
    %c0 = arith.constant 0 : index
    %c0_1 = arith.constant 0 : index
    %3 = vector.load %arg4[%c0, %c0_1] : memref<256x512xbf16, #tpu.memory_space<vmem>>, vector<256x512xbf16>
    %c0_2 = arith.constant 0 : index
    %c0_3 = arith.constant 0 : index
    %4 = vector.load %arg5[%c0_2, %c0_3] : memref<128x128xbf16, #tpu.memory_space<vmem>>, vector<128x128xbf16>
    %c0_4 = arith.constant 0 : index
    %c0_5 = arith.constant 0 : index
    %5 = vector.load %arg6[%c0_4, %c0_5] : memref<1x512xf32, #tpu.memory_space<vmem>>, vector<1x512xf32>
    %6 = vector.shape_cast %5 : vector<1x512xf32> to vector<1x512xf32>
    %7 = vector.broadcast %6 : vector<1x512xf32> to vector<8x512xf32>
    %c0_6 = arith.constant 0 : index
    %c0_7 = arith.constant 0 : index
    %8 = vector.load %arg7[%c0_6, %c0_7] : memref<1x128xf32, #tpu.memory_space<vmem>>, vector<1x128xf32>
    %9 = vector.shape_cast %8 : vector<1x128xf32> to vector<1x128xf32>
    %10 = vector.broadcast %9 : vector<1x128xf32> to vector<8x128xf32>
    %c0_i32_8 = arith.constant 0 : i32
    %11 = arith.index_cast %c0_i32_8 : i32 to index
    %c0_9 = arith.constant 0 : index
    %c0_10 = arith.constant 0 : index
    %12 = vector.load %arg1[%11, %c0_9, %c0_10] : memref<1x8x128xf32, #tpu.memory_space<vmem>>, vector<1x8x128xf32>
    %13 = vector.shape_cast %12 : vector<1x8x128xf32> to vector<8x128xf32>
    %c0_11 = arith.constant 0 : index
    %c0_12 = arith.constant 0 : index
    %14 = vector.load %arg11[%c0_11, %c0_12] : memref<8x256xf32, #tpu.memory_space<vmem>>, vector<8x128xf32>
    tpu.vector_store %arg11[%c0_11, %c0_12], %13 {strides = array<i32>} : memref<8x256xf32, #tpu.memory_space<vmem>>, vector<8x128xf32>,
    %c0_13 = arith.constant 0 : index
    %c0_14 = arith.constant 0 : index
    %15 = vector.load %arg11[%c0_13, %c0_14] : memref<8x256xf32, #tpu.memory_space<vmem>>, vector<8x256xf32>
    %16 = arith.truncf %15 : vector<8x256xf32> to vector<8x256xbf16>
    %cst = arith.constant dense<0.000000e+00> : vector<8x512xf32>
    %17 = tpu.matmul %16, %3, %cst {dimension_numbers = #tpu.dot_dimension_numbers<[1], [0], [0], [1], [0, 0, 1, 1], [], []>} : vector<8x256xbf16>, vector<256x512xbf16>, vector<8x512xf32> -> vector<8x512xf32>
    %18 = arith.addf %17, %7 : vector<8x512xf32>
    %19 = vector.extract_strided_slice %18 {offsets = [0, 0], sizes = [8, 384], strides = [1, 1]} : vector<8x512xf32> to vector<8x384xf32>
    %20 = arith.negf %19 : vector<8x384xf32>
    %21 = math.exp %20 : vector<8x384xf32>
    %cst_15 = arith.constant 1.000000e+00 : f32
    %22 = vector.broadcast %cst_15 : f32 to vector<8x384xf32>
    %23 = arith.addf %22, %21 : vector<8x384xf32>
    %24 = arith.divf %22, %23 : vector<8x384xf32>
    %25 = vector.extract_strided_slice %18 {offsets = [0, 384], sizes = [8, 128], strides = [1, 1]} : vector<8x512xf32> to vector<8x128xf32>
    %26 = math.tanh %25 : vector<8x128xf32>
    %27 = vector.extract_strided_slice %24 {offsets = [0, 0], sizes = [8, 128], strides = [1, 1]} : vector<8x384xf32> to vector<8x128xf32>
    %28 = vector.extract_strided_slice %24 {offsets = [0, 128], sizes = [8, 128], strides = [1, 1]} : vector<8x384xf32> to vector<8x128xf32>
    %29 = vector.extract_strided_slice %24 {offsets = [0, 256], sizes = [8, 128], strides = [1, 1]} : vector<8x384xf32> to vector<8x128xf32>
    %c0_16 = arith.constant 0 : index
    %c0_17 = arith.constant 0 : index
    %30 = vector.load %arg12[%c0_16, %c0_17] : memref<8x128xf32, #tpu.memory_space<vmem>>, vector<8x128xf32>
    %31 = arith.mulf %28, %30 : vector<8x128xf32>
    %32 = arith.mulf %27, %26 : vector<8x128xf32>
    %33 = arith.addf %31, %32 : vector<8x128xf32>
    %34 = math.tanh %33 : vector<8x128xf32>
    %35 = arith.mulf %29, %34 : vector<8x128xf32>
    %c0_18 = arith.constant 0 : index
    %c0_19 = arith.constant 0 : index
    %36 = vector.load %arg12[%c0_18, %c0_19] : memref<8x128xf32, #tpu.memory_space<vmem>>, vector<8x128xf32>
    tpu.vector_store %arg12[%c0_18, %c0_19], %33 {strides = array<i32>} : memref<8x128xf32, #tpu.memory_space<vmem>>, vector<8x128xf32>,
    %c0_20 = arith.constant 0 : index
    %c128 = arith.constant 128 : index
    %37 = vector.load %arg11[%c0_20, %c128] : memref<8x256xf32, #tpu.memory_space<vmem>>, vector<8x128xf32>
    tpu.vector_store %arg11[%c0_20, %c128], %35 {strides = array<i32>} : memref<8x256xf32, #tpu.memory_space<vmem>>, vector<8x128xf32>,
    %38 = arith.truncf %35 : vector<8x128xf32> to vector<8x128xbf16>
    %cst_21 = arith.constant dense<0.000000e+00> : vector<8x128xf32>
    %39 = tpu.matmul %38, %4, %cst_21 {dimension_numbers = #tpu.dot_dimension_numbers<[1], [0], [0], [1], [0, 0, 1, 1], [], []>} : vector<8x128xbf16>, vector<128x128xbf16>, vector<8x128xf32> -> vector<8x128xf32>
    %40 = arith.addf %39, %10 : vector<8x128xf32>
    %41 = arith.index_cast %c0_i32_8 : i32 to index
    %c0_22 = arith.constant 0 : index
    %c0_23 = arith.constant 0 : index
    %42 = vector.load %arg8[%41, %c0_22, %c0_23] : memref<1x8x128xf32, #tpu.memory_space<vmem>>, vector<1x8x128xf32>
    %43 = vector.shape_cast %42 : vector<1x8x128xf32> to vector<8x128xf32>
    %44 = vector.shape_cast %40 : vector<8x128xf32> to vector<1x8x128xf32>
    tpu.vector_store %arg8[%41, %c0_22, %c0_23], %44 {strides = array<i32>} : memref<1x8x128xf32, #tpu.memory_space<vmem>>, vector<1x8x128xf32>,
    %c1_i32 = arith.constant 1 : i32
    %c0_i32_24 = arith.constant 0 : i32
    %45 = arith.cmpi eq, %arg0, %c0_i32_24 : i32
    %46 = arith.extui %45 : i1 to i32
    %c0_i32_25 = arith.constant 0 : i32
    %47 = arith.cmpi ne, %46, %c0_i32_25 : i32
    scf.if %47 {
      %c0_26 = arith.constant 0 : index
      %c128_27 = arith.constant 128 : index
      %48 = vector.load %arg11[%c0_26, %c128_27] : memref<8x256xf32, #tpu.memory_space<vmem>>, vector<8x128xf32>
      %c0_28 = arith.constant 0 : index
      %c0_29 = arith.constant 0 : index
      %49 = vector.load %arg9[%c0_28, %c0_29] : memref<8x128xf32, #tpu.memory_space<vmem>>, vector<8x128xf32>
      tpu.vector_store %arg9[%c0_28, %c0_29], %48 {strides = array<i32>} : memref<8x128xf32, #tpu.memory_space<vmem>>, vector<8x128xf32>,
      %c0_30 = arith.constant 0 : index
      %c0_31 = arith.constant 0 : index
      %50 = vector.load %arg12[%c0_30, %c0_31] : memref<8x128xf32, #tpu.memory_space<vmem>>, vector<8x128xf32>
      %c0_32 = arith.constant 0 : index
      %c0_33 = arith.constant 0 : index
      %51 = vector.load %arg10[%c0_32, %c0_33] : memref<8x128xf32, #tpu.memory_space<vmem>>, vector<8x128xf32>
      tpu.vector_store %arg10[%c0_32, %c0_33], %50 {strides = array<i32>} : memref<8x128xf32, #tpu.memory_space<vmem>>, vector<8x128xf32>,
    } else {
    }
    return
  }
  func.func @transform_0(%arg0: i32) -> (i32, i32, i32) {
    %c0_i32 = arith.constant 0 : i32
    %c0_i32_0 = arith.constant 0 : i32
    %c0_i32_1 = arith.constant 0 : i32
    return %arg0, %c0_i32, %c0_i32_0 : i32, i32, i32
  }
  func.func @transform_1(%arg0: i32) -> (i32, i32) {
    %c0_i32 = arith.constant 0 : i32
    %c0_i32_0 = arith.constant 0 : i32
    %c0_i32_1 = arith.constant 0 : i32
    return %c0_i32, %c0_i32_0 : i32, i32
  }
  func.func @transform_2(%arg0: i32) -> (i32, i32) {
    %c0_i32 = arith.constant 0 : i32
    %c0_i32_0 = arith.constant 0 : i32
    %c0_i32_1 = arith.constant 0 : i32
    return %c0_i32, %c0_i32_0 : i32, i32
  }
  func.func @transform_3(%arg0: i32) -> (i32, i32) {
    %c0_i32 = arith.constant 0 : i32
    %c0_i32_0 = arith.constant 0 : i32
    %c0_i32_1 = arith.constant 0 : i32
    return %c0_i32, %c0_i32_0 : i32, i32
  }
  func.func @transform_4(%arg0: i32) -> (i32, i32) {
    %c0_i32 = arith.constant 0 : i32
    %c0_i32_0 = arith.constant 0 : i32
    %c0_i32_1 = arith.constant 0 : i32
    return %c0_i32, %c0_i32_0 : i32, i32
  }
  func.func @transform_5(%arg0: i32) -> (i32, i32) {
    %c0_i32 = arith.constant 0 : i32
    %c0_i32_0 = arith.constant 0 : i32
    %c0_i32_1 = arith.constant 0 : i32
    return %c0_i32, %c0_i32_0 : i32, i32
  }
  func.func @transform_6(%arg0: i32) -> (i32, i32) {
    %c0_i32 = arith.constant 0 : i32
    %c0_i32_0 = arith.constant 0 : i32
    %c0_i32_1 = arith.constant 0 : i32
    return %c0_i32, %c0_i32_0 : i32, i32
  }
  func.func @transform_7(%arg0: i32) -> (i32, i32, i32) {
    %c0_i32 = arith.constant 0 : i32
    %c0_i32_0 = arith.constant 0 : i32
    %c0_i32_1 = arith.constant 0 : i32
    return %arg0, %c0_i32, %c0_i32_0 : i32, i32, i32
  }
  func.func @transform_8(%arg0: i32) -> (i32, i32) {
    %c0_i32 = arith.constant 0 : i32
    %c0_i32_0 = arith.constant 0 : i32
    %c0_i32_1 = arith.constant 0 : i32
    return %c0_i32, %c0_i32_0 : i32, i32
  }
  func.func @transform_9(%arg0: i32) -> (i32, i32) {
    %c0_i32 = arith.constant 0 : i32
    %c0_i32_0 = arith.constant 0 : i32
    %c0_i32_1 = arith.constant 0 : i32
    return %c0_i32, %c0_i32_0 : i32, i32
  }
}

</mosaic_0001>

<bundles_post_ra>
// kernel: tpu_custom_call.1
= control target key start
LH: loop header
LB: loop body
LE: loop exit
PB: predicated region body
PF: predicated region fallthrough
CT: control target
= control target key end

     0   :  { %15 = vsyncpa [#allocation5], 0  ;;  %s1290_s0 = inlined_call_operand.hbm [shape: f32[1,8,128], index: 0, kind: input, shape index: {}]   ;;  %s1291_s1 = inlined_call_operand.hbm [shape: f32[8,128], index: 1, kind: input, shape index: {}]   ;;  %s1292_s2 = inlined_call_operand.hbm [shape: f32[8,128], index: 2, kind: input, shape index: {}]   ;;  %s1293_s3 = inlined_call_operand.hbm [shape: bf16[256,512], index: 3, kind: input, shape index: {}]   ;;  %s1294_s4 = inlined_call_operand.hbm [shape: bf16[128,128], index: 4, kind: input, shape index: {}]   ;;  %s1295_s5 = inlined_call_operand.vmem [shape: f32[1,512], index: 5, kind: input, shape index: {}]   ;;  %s1296_s6 = inlined_call_operand.vmem [shape: f32[1,128], index: 6, kind: input, shape index: {}]   ;;  %s1297_s7 = inlined_call_operand.hbm [shape: f32[1,8,128], index: 7, kind: output, shape index: {0}]   ;;  %s1298_s8 = inlined_call_operand.hbm [shape: f32[8,128], index: 8, kind: output, shape index: {1}]   ;;  %s1299_s9 = inlined_call_operand.hbm [shape: f32[8,128], index: 9, kind: output, shape index: {2}]  }
   0x1   :  { %16 = vsyncpa [#allocation8], 0 }
   0x2   :  { %17 = vsyncpa [#allocation11], 0 }
   0x3   :  { %18 = vsyncpa [#allocation6], 0 }
   0x4   :  { %19 = vsyncpa [#allocation15], 0  ;;  %s1196_s30 = smov [#allocation7]   ;;  %s1197_s11 = smov [#allocation10]  }
   0x5   :  { %s36_s10 = sshll.u32 %s1196_s30, 4  ;;  %s55_s12 = sshll.u32 %s1197_s11, 4  ;;  %s37_s10 = int_to_ptr.vmem [resolvable:$true] %s36_s10  ;;  %s56_s12 = int_to_ptr.vmem [resolvable:$true] %s55_s12 }
   0x6   :  { %s1034_s13 = scalar_lea.vmem %s37_s10, 128  ;;  %p1039_p1 = scmp.lt.s32.totalorder %s37_s10, %s37_s10 }
   0x7   :  { %p1035_p0 = scmp.ne.s32.totalorder %s37_s10, %s1034_s13  ;;  %p1040_p2 = scmp.lt.s32.totalorder %s1034_s13, %s1034_s13 }
   0x9   :  { %p1041_p3 = por %p1040_p2, %p1039_p1 }
   0xb   :  { %p1042_p4 = pnand %p1041_p3, %p1035_p0 }
   0xd   :  { %1045 = shalt.err (!%p1042_p4)
}
   0xe   :  { %39 = dma.hbm_to_vmem [thread:$0]  %s1291_s1, 128, %s37_s10, [#allocation8]  }
   0xf   :  { %s1054_s16 = scalar_lea.vmem %s56_s12, 8192  ;;  %p1059_p6 = scmp.lt.s32.totalorder %s56_s12, %s56_s12 }
  0x10   :  { %p1055_p5 = scmp.ne.s32.totalorder %s56_s12, %s1054_s16  ;;  %p1060_p7 = scmp.lt.s32.totalorder %s1054_s16, %s1054_s16 }
  0x12   :  { %p1061_p8 = por %p1060_p7, %p1059_p6 }
  0x14   :  { %p1062_p9 = pnand %p1061_p8, %p1055_p5 }
  0x16   :  { %1065 = shalt.err (!%p1062_p9)
}
  0x17   :  { %s1198_s17 = smov 256   ;;  %s1199_s18 = smov 16  }
  0x18   :  { %61 = dma.hbm_to_vmem [thread:$0]  %s1293_s3, 8192, %s56_s12, [#allocation11], %s1198_s17, %s1198_s17, %s1199_s18  }
  0x19   :  { %s1200_s21 = smov [#allocation4]   ;;  %s1201_s23 = smov [#allocation9]  }
  0x1a   :  { %s26_s22 = sshll.u32 %s1200_s21, 4  ;;  %s46_s24 = sshll.u32 %s1201_s23, 4  ;;  %s27_s22 = int_to_ptr.vmem [resolvable:$true] %s26_s22  ;;  %s47_s24 = int_to_ptr.vmem [resolvable:$true] %s46_s24 }
  0x1b   :  { %s1074_s1 = scalar_lea.vmem %s27_s22, 128  ;;  %p1079_p11 = scmp.lt.s32.totalorder %s27_s22, %s27_s22 }
  0x1c   :  { %p1075_p10 = scmp.ne.s32.totalorder %s27_s22, %s1074_s1  ;;  %p1080_p12 = scmp.lt.s32.totalorder %s1074_s1, %s1074_s1 }
  0x1e   :  { %p1081_p13 = por %p1080_p12, %p1079_p11 }
  0x20   :  { %p1082_p0 = pnand %p1081_p13, %p1075_p10 }
  0x22   :  { %1085 = shalt.err (!%p1082_p0)
}
  0x23   :  { %29 = dma.hbm_to_vmem [thread:$0]  %s1290_s0, 128, %s27_s22, [#allocation5]  }
  0x24   :  { %s1094_s27 = scalar_lea.vmem %s47_s24, 128  ;;  %p1099_p2 = scmp.lt.s32.totalorder %s47_s24, %s47_s24 }
  0x25   :  { %p1095_p1 = scmp.ne.s32.totalorder %s47_s24, %s1094_s27  ;;  %p1100_p3 = scmp.lt.s32.totalorder %s1094_s27, %s1094_s27 }
  0x27   :  { %p1101_p4 = por %p1100_p3, %p1099_p2 }
  0x29   :  { %p1102_p5 = pnand %p1101_p4, %p1095_p1 }
  0x2b   :  { %1105 = shalt.err (!%p1102_p5)
}
  0x2c   :  { %49 = dma.hbm_to_vmem [thread:$0]  %s1292_s2, 128, %s47_s24, [#allocation8]  }
  0x2d   :  { %s1202_s29 = smov [#allocation12]  }
  0x2e   :  { %s67_s30 = sshll.u32 %s1202_s29, 4  ;;  %s68_s30 = int_to_ptr.vmem [resolvable:$true] %s67_s30 }
  0x2f   :  { %s1114_s10 = scalar_lea.vmem %s68_s30, 1024  ;;  %p1119_p7 = scmp.lt.s32.totalorder %s68_s30, %s68_s30 }
  0x30   :  { %p1115_p6 = scmp.ne.s32.totalorder %s68_s30, %s1114_s10  ;;  %p1120_p8 = scmp.lt.s32.totalorder %s1114_s10, %s1114_s10 }
  0x32   :  { %p1121_p9 = por %p1120_p8, %p1119_p7 }
  0x34   :  { %p1122_p10 = pnand %p1121_p9, %p1115_p6 }
  0x36   :  { %1125 = shalt.err (!%p1122_p10)
}
  0x37   :  { %s1203_s0 = smov 64   ;;  %s1204_s11 = smov 4  }
  0x38   :  { %73 = dma.hbm_to_vmem [thread:$0]  %s1294_s4, 1024, %s68_s30, [#allocation11], %s1203_s0, %s1203_s0, %s1204_s11  }
  0x39   :  { %1186 = dma.done.wait [#allocation5], 128  }
  0x3a   :  { %1187 = vsyncadd [#allocation5], 4294967168 }
  0x3b   :  { %1188 = dma.done.wait [#allocation8], 256  }
  0x3c   :  { %1189 = vsyncadd [#allocation8], 4294967040 }
  0x3d   :  { %1190 = dma.done.wait [#allocation11], 9216  }
  0x3e   :  { %1191 = vsyncadd [#allocation11], 4294958080  ;;  %v906_v0 = vld [vmem:[#allocation10 + $0xe4] ss:$16 sps:$4 sm:$0xff]   ;;  %v908_v1 = vld [vmem:[#allocation10 + $0xe0] ss:$16 sps:$4 sm:$0xff]  }
  0x3f   :  { %537 = vmatprep.subr.bf16.mxu0 %v906_v0  ;;  %v909_v2 = vld [vmem:[#allocation10 + $0xc4] ss:$16 sps:$4 sm:$0xff]   ;;  %v911_v3 = vld [vmem:[#allocation10 + $0xc0] ss:$16 sps:$4 sm:$0xff]   ;;  %v917_v5 = vld [vmem:[#allocation10 + $0xec] ss:$16 sps:$4 sm:$0xff]  }
  0x40   :  { %538 = vmatpush1.bf16.msra.mxu0 %v908_v1  ;;  %v912_v4 = vld [vmem:[#allocation10 + $0xa4] ss:$16 sps:$4 sm:$0xff]   ;;  %v920_v6 = vld [vmem:[#allocation10 + $0xe8] ss:$16 sps:$4 sm:$0xff]   ;;  %v914_v7 = vld [vmem:[#allocation10 + $0xa0] ss:$16 sps:$4 sm:$0xff]   ;;  %578 = vmatprep.subr.bf16.mxu1 %v917_v5 }
  0x41   :  { %539 = vmatprep.subr.bf16.mxu0 %v909_v2  ;;  %v915_v8 = vld [vmem:[#allocation10 + $0x84] ss:$16 sps:$4 sm:$0xff]   ;;  %579 = vmatpush1.bf16.msra.mxu1 %v920_v6  ;;  %v923_v9 = vld [vmem:[#allocation10 + $0xcc] ss:$16 sps:$4 sm:$0xff]   ;;  %v926_v10 = vld [vmem:[#allocation10 + $0xc8] ss:$16 sps:$4 sm:$0xff]  }
  0x42   :  { %580 = vmatprep.subr.bf16.mxu1 %v923_v9  ;;  %v919_v11 = vld [vmem:[#allocation10 + $0x80] ss:$16 sps:$4 sm:$0xff]   ;;  %v921_v12 = vld [vmem:[#allocation10 + $0x64] ss:$16 sps:$4 sm:$0xff]   ;;  %v929_v13 = vld [vmem:[#allocation10 + $0xac] ss:$16 sps:$4 sm:$0xff]  }
  0x43   :  { %v932_v14 = vld [vmem:[#allocation10 + $0xa8] ss:$16 sps:$4 sm:$0xff]   ;;  %v935_v15 = vld [vmem:[#allocation10 + $0x8c] ss:$16 sps:$4 sm:$0xff]   ;;  %v925_v16 = vld [vmem:[#allocation10 + $0x60] ss:$16 sps:$4 sm:$0xff]  }
  0x44   :  { %540 = vmatpush1.bf16.msra.mxu0 %v911_v3  ;;  %v927_v17 = vld [vmem:[#allocation10 + $0x44] ss:$16 sps:$4 sm:$0xff]   ;;  %v938_v18 = vld [vmem:[#allocation10 + $0x88] ss:$16 sps:$4 sm:$0xff]   ;;  %v941_v19 = vld [vmem:[#allocation10 + $0x6c] ss:$16 sps:$4 sm:$0xff]  }
  0x45   :  { %541 = vmatprep.subr.bf16.mxu0 %v912_v4  ;;  %581 = vmatpush1.bf16.msra.mxu1 %v926_v10  ;;  %v931_v20 = vld [vmem:[#allocation10 + $0x40] ss:$16 sps:$4 sm:$0xff]   ;;  %v933_v21 = vld [vmem:[#allocation10 + $0x24] ss:$16 sps:$4 sm:$0xff]   ;;  %v944_v22 = vld [vmem:[#allocation10 + $0x68] ss:$16 sps:$4 sm:$0xff]  }
  0x46   :  { %582 = vmatprep.subr.bf16.mxu1 %v929_v13  ;;  %v947_v23 = vld [vmem:[#allocation10 + $0x4c] ss:$16 sps:$4 sm:$0xff]   ;;  %v937_v24 = vld [vmem:[#allocation10 + $0x20] ss:$16 sps:$4 sm:$0xff]   ;;  %v939_v25 = vld [vmem:[#allocation10 + $0x4] ss:$16 sps:$4 sm:$0xff]   ;;  %v184_v13 = vlaneseq }
  0x47   :  { %v950_v26 = vld [vmem:[#allocation10 + $0x48] ss:$16 sps:$4 sm:$0xff]   ;;  %v953_v27 = vld [vmem:[#allocation10 + $0x2c] ss:$16 sps:$4 sm:$0xff]   ;;  %v943_v28 = vld [vmem:[#allocation10] ss:$16 sps:$4 sm:$0xff]  }
  0x48   :  { %542 = vmatpush1.bf16.msra.mxu0 %v914_v7  ;;  %v945_v29 = vld [vmem:[#allocation10 + $0x1e4] ss:$16 sps:$4 sm:$0xff]   ;;  %v956_v30 = vld [vmem:[#allocation10 + $0x28] ss:$16 sps:$4 sm:$0xff]   ;;  %v959_v31 = vld [vmem:[#allocation10 + $0xc] ss:$16 sps:$4 sm:$0xff]  }
  0x49   :  { %543 = vmatprep.subr.bf16.mxu0 %v915_v8  ;;  %583 = vmatpush1.bf16.msra.mxu1 %v932_v14  ;;  %v949_v32 = vld [vmem:[#allocation10 + $0x1e0] ss:$16 sps:$4 sm:$0xff]   ;;  %v951_v33 = vld [vmem:[#allocation10 + $0x1c4] ss:$16 sps:$4 sm:$0xff]   ;;  %v962_v34 = vld [vmem:[#allocation10 + $0x8] ss:$16 sps:$4 sm:$0xff]  }
  0x4a   :  { %584 = vmatprep.subr.bf16.mxu1 %v935_v15  ;;  %v965_v35 = vld [vmem:[#allocation10 + $0x1ec] ss:$16 sps:$4 sm:$0xff]   ;;  %v955_v36 = vld [vmem:[#allocation10 + $0x1c0] ss:$16 sps:$4 sm:$0xff]   ;;  %v957_v37 = vld [vmem:[#allocation10 + $0x1a4] ss:$16 sps:$4 sm:$0xff]  }
  0x4b   :  { %v968_v38 = vld [vmem:[#allocation10 + $0x1e8] ss:$16 sps:$4 sm:$0xff]   ;;  %v971_v39 = vld [vmem:[#allocation10 + $0x1cc] ss:$16 sps:$4 sm:$0xff]   ;;  %v98_v40 = vld [vmem:[#allocation7] sm:$0xff]  ;;  %v1205_v5 = vmov 0.0  }
  0x4c   :  { %544 = vmatpush1.bf16.msra.mxu0 %v919_v11  ;;  %v961_v41 = vld [vmem:[#allocation10 + $0x1a0] ss:$16 sps:$4 sm:$0xff]   ;;  %v216_v42 = vpack.c.bf16 %v98_v40, %v98_v40  ;;  %v963_v43 = vld [vmem:[#allocation10 + $0x184] ss:$16 sps:$4 sm:$0xff]   ;;  %v974_v44 = vld [vmem:[#allocation10 + $0x1c8] ss:$16 sps:$4 sm:$0xff]  }
  0x4d   :  { %545 = vmatprep.subr.bf16.mxu0 %v921_v12  ;;  %585 = vmatpush1.bf16.msra.mxu1 %v938_v18  ;;  %v967_v45 = vld [vmem:[#allocation10 + $0x180] ss:$16 sps:$4 sm:$0xff]   ;;  %v977_v46 = vld [vmem:[#allocation10 + $0x1ac] ss:$16 sps:$4 sm:$0xff]   ;;  %v969_v47 = vld [vmem:[#allocation10 + $0x164] ss:$16 sps:$4 sm:$0xff]  }
  0x4e   :  { %586 = vmatprep.subr.bf16.mxu1 %v941_v19  ;;  %569 = vmatprep.mubr.bf16.mxu0 %v216_v42  ;;  %v980_v48 = vld [vmem:[#allocation10 + $0x1a8] ss:$16 sps:$4 sm:$0xff]   ;;  %v983_v49 = vld [vmem:[#allocation10 + $0x18c] ss:$16 sps:$4 sm:$0xff]   ;;  %v973_v50 = vld [vmem:[#allocation10 + $0x160] ss:$16 sps:$4 sm:$0xff]  }
  0x4f   :  { %610 = vmatprep.mubr.bf16.mxu1 %v216_v42  ;;  %v975_v51 = vld [vmem:[#allocation10 + $0x144] ss:$16 sps:$4 sm:$0xff]   ;;  %v986_v52 = vld [vmem:[#allocation10 + $0x188] ss:$16 sps:$4 sm:$0xff]   ;;  %v989_v53 = vld [vmem:[#allocation10 + $0x16c] ss:$16 sps:$4 sm:$0xff]  }
  0x50   :  { %546 = vmatpush1.bf16.msra.mxu0 %v925_v16  ;;  %v979_v54 = vld [vmem:[#allocation10 + $0x140] ss:$16 sps:$4 sm:$0xff]   ;;  %v981_v55 = vld [vmem:[#allocation10 + $0x124] ss:$16 sps:$4 sm:$0xff]   ;;  %v992_v56 = vld [vmem:[#allocation10 + $0x168] ss:$16 sps:$4 sm:$0xff]  }
  0x51   :  { %547 = vmatprep.subr.bf16.mxu0 %v927_v17  ;;  %587 = vmatpush1.bf16.msra.mxu1 %v944_v22  ;;  %v993_v57 = vld [vmem:[#allocation10 + $0x14c] ss:$16 sps:$4 sm:$0xff]   ;;  %v985_v58 = vld [vmem:[#allocation10 + $0x120] ss:$16 sps:$4 sm:$0xff]   ;;  %v987_v59 = vld [vmem:[#allocation10 + $0x104] ss:$16 sps:$4 sm:$0xff]  }
  0x52   :  { %588 = vmatprep.subr.bf16.mxu1 %v947_v23  ;;  %v995_v60 = vld [vmem:[#allocation10 + $0x148] ss:$16 sps:$4 sm:$0xff]   ;;  %v996_v61 = vld [vmem:[#allocation10 + $0x12c] ss:$16 sps:$4 sm:$0xff]   ;;  %v991_v62 = vld [vmem:[#allocation10 + $0x100] ss:$16 sps:$4 sm:$0xff]  }
  0x53   :  { %v211_v63 = vld [vmem:[#allocation4] sm:$0xff]  ;;  %v1002_v4 = vld [vmem:[#allocation12 + $0x38] sm:$0xff]   ;;  %v1003_v6 = vld [vmem:[#allocation12 + $0x30] sm:$0xff]   ;;  %vm1206_vm0 = vmmov 0   ;;  %v185_v14 = vshrl.u32 %v184_v13, 7 }
  0x54   :  { %548 = vmatpush1.bf16.msra.mxu0 %v931_v20  ;;  %v998_v0 = vld [vmem:[#allocation10 + $0x128] ss:$16 sps:$4 sm:$0xff]   ;;  %v999_v1 = vld [vmem:[#allocation10 + $0x10c] ss:$16 sps:$4 sm:$0xff]   ;;  %v215_v2 = vpack.c.bf16 %v211_v63, %v211_v63  ;;  %v1005_v8 = vld [vmem:[#allocation12 + $0x20] sm:$0xff]  }
  0x55   :  { %549 = vmatprep.subr.bf16.mxu0 %v933_v21  ;;  %589 = vmatpush1.bf16.msra.mxu1 %v950_v26  ;;  %v1001_v3 = vld [vmem:[#allocation10 + $0x108] ss:$16 sps:$4 sm:$0xff]   ;;  %v1007_v10 = vld [vmem:[#allocation12 + $0x10] sm:$0xff]   ;;  %v1009_v12 = vld [vmem:[#allocation12] sm:$0xff]   ;;  %v186_v15 = vsub.s32 0, %v185_v14  ;;  %v190_v17 = vsub.s32 1, %v185_v14 }
  0x56   :  { %590 = vmatprep.subr.bf16.mxu1 %v953_v27  ;;  %v1004_v7 = vld [vmem:[#allocation12 + $0x28] sm:$0xff]   ;;  %v1006_v9 = vld [vmem:[#allocation12 + $0x18] sm:$0xff]  }
  0x57   :  { %v1008_v11 = vld [vmem:[#allocation12 + $0x8] sm:$0xff]  }
  0x58   :  { %550 = vmatpush1.bf16.msra.mxu0 %v937_v24  ;;  %v182_v16 = vld [vmem:[%s1295_s5] sm:$0xf]  ;;  %s1207_s5 = smov [#allocation14]  }
  0x59   :  { %551 = vmatprep.subr.bf16.mxu0 %v939_v25  ;;  %591 = vmatpush1.bf16.msra.mxu1 %v956_v30  ;;  %v187_v18 = vrot.slane %v182_v16, %v186_v15  ;;  %v191_v19 = vrot.slane %v182_v16, %v190_v17  ;;  %v194_v25 = vsub.s32 2, %v185_v14  ;;  %s759_s14 = sshll.u32 %s1207_s5, 4  ;;  %s760_s14 = int_to_ptr.vmem [resolvable:$true] %s759_s14 }
  0x5a   :  { %592 = vmatprep.subr.bf16.mxu1 %v959_v31  ;;  %s1126_s15 = scalar_lea.vmem %s760_s14, 128  ;;  %p1131_p12 = scmp.lt.s32.totalorder %s760_s14, %s760_s14 }
  0x5b   :  { %v195_v30 = vrot.slane %v182_v16, %v194_v25  ;;  %p1127_p11 = scmp.ne.s32.totalorder %s760_s14, %s1126_s15  ;;  %p1132_p13 = scmp.lt.s32.totalorder %s1126_s15, %s1126_s15 }
  0x5c   :  { %552 = vmatpush1.bf16.msra.mxu0 %v943_v28 }
  0x5d   :  { %553 = vmatprep.subr.bf16.mxu0 %v945_v29  ;;  %593 = vmatpush1.bf16.msra.mxu1 %v962_v34  ;;  %p1133_p0 = por %p1132_p13, %p1131_p12 }
  0x5e   :  { %594 = vmatprep.subr.bf16.mxu1 %v965_v35 }
  0x5f   :  { %p1134_p1 = pnand %p1133_p0, %p1127_p11 }
  0x60   :  { %554 = vmatpush2.bf16.msra.mxu0 %v949_v32  ;;  %v198_v32 = vsub.s32 3, %v185_v14 }
  0x61   :  { %555 = vmatprep.subr.bf16.mxu0 %v951_v33  ;;  %595 = vmatpush2.bf16.msra.mxu1 %v968_v38 }
  0x62   :  { %596 = vmatprep.subr.bf16.mxu1 %v971_v39 }
  0x64   :  { %556 = vmatpush2.bf16.msra.mxu0 %v955_v36  ;;  %v199_v36 = vrot.slane %v182_v16, %v198_v32 }
  0x65   :  { %557 = vmatprep.subr.bf16.mxu0 %v957_v37  ;;  %597 = vmatpush2.bf16.msra.mxu1 %v974_v44 }
  0x66   :  { %598 = vmatprep.subr.bf16.mxu1 %v977_v46  ;;  %v100_v46 = vld [vmem:[#allocation9] sm:$0xff] }
  0x68   :  { %558 = vmatpush2.bf16.msra.mxu0 %v961_v41 }
  0x69   :  { %559 = vmatprep.subr.bf16.mxu0 %v963_v43  ;;  %599 = vmatpush2.bf16.msra.mxu1 %v980_v48 }
  0x6a   :  { %600 = vmatprep.subr.bf16.mxu1 %v983_v49 }
  0x6c   :  { %560 = vmatpush2.bf16.msra.mxu0 %v967_v45 }
  0x6d   :  { %561 = vmatprep.subr.bf16.mxu0 %v969_v47  ;;  %601 = vmatpush2.bf16.msra.mxu1 %v986_v52 }
  0x6e   :  { %602 = vmatprep.subr.bf16.mxu1 %v989_v53 }
  0x70   :  { %562 = vmatpush2.bf16.msra.mxu0 %v973_v50 }
  0x71   :  { %563 = vmatprep.subr.bf16.mxu0 %v975_v51  ;;  %603 = vmatpush2.bf16.msra.mxu1 %v992_v56 }
  0x72   :  { %604 = vmatprep.subr.bf16.mxu1 %v993_v57 }
  0x74   :  { %564 = vmatpush2.bf16.msra.mxu0 %v979_v54 }
  0x75   :  { %565 = vmatprep.subr.bf16.mxu0 %v981_v55  ;;  %605 = vmatpush2.bf16.msra.mxu1 %v995_v60 }
  0x76   :  { %606 = vmatprep.subr.bf16.mxu1 %v996_v61 }
  0x78   :  { %566 = vmatpush2.bf16.msra.mxu0 %v985_v58 }
  0x79   :  { %567 = vmatprep.subr.bf16.mxu0 %v987_v59  ;;  %607 = vmatpush2.bf16.msra.mxu1 %v998_v0 }
  0x7a   :  { %608 = vmatprep.subr.bf16.mxu1 %v999_v1 }
  0x7c   :  { %568 = vmatpush2.bf16.msra.mxu0 %v991_v62 }
  0x7d   :  { %609 = vmatpush2.bf16.msra.mxu1 %v1001_v3  ;;  %872 = vmatprep.subr.bf16.mxu0 %v1205_v5 }
  0x7f   :  { %570 = vmatmul.mubr.bf16.vlgmr.msra.gmra.mxu0 %v215_v2 }
  0x80   :  { %611 = vmatmul.mubr.bf16.vlgmr.msra.gmra.mxu1 %v215_v2  ;;  %873 = vmatpush3.bf16.msra.mxu0 %v1002_v4 }
  0x81   :  { %874 = vmatprep.subr.bf16.mxu0 %v1205_v5  ;;  %888 = vmatprep.mubr.msk.bf16.mxu0 %vm1206_vm0, %v1205_v5 }
  0x84   :  { %875 = vmatpush3.bf16.msra.mxu0 %v1003_v6 }
  0x85   :  { %876 = vmatprep.subr.bf16.mxu0 %v1205_v5 }
  0x88   :  { %877 = vmatpush3.bf16.msra.mxu0 %v1004_v7 }
  0x89   :  { %878 = vmatprep.subr.bf16.mxu0 %v1205_v5 }
  0x8c   :  { %879 = vmatpush3.bf16.msra.mxu0 %v1005_v8 }
  0x8d   :  { %880 = vmatprep.subr.bf16.mxu0 %v1205_v5 }
  0x90   :  { %881 = vmatpush3.bf16.msra.mxu0 %v1006_v9 }
  0x91   :  { %882 = vmatprep.subr.bf16.mxu0 %v1205_v5 }
  0x94   :  { %883 = vmatpush3.bf16.msra.mxu0 %v1007_v10 }
  0x95   :  { %884 = vmatprep.subr.bf16.mxu0 %v1205_v5 }
  0x98   :  { %885 = vmatpush3.bf16.msra.mxu0 %v1008_v11 }
  0x99   :  { %886 = vmatprep.subr.bf16.mxu0 %v1205_v5 }
  0x9c   :  { %887 = vmatpush3.bf16.msra.mxu0 %v1009_v12 }
 0x13f   :  { %v571_v20 = vpop.f32.mrf.mxu0 }
 0x140   :  { %v572_v21 = vadd.f32 %v571_v20, %v187_v18  ;;  %v612_v28 = vpop.f32.mrf.mxu1 }
 0x141   :  { %v573_v22 = vpop.f32.mrf.mxu0  ;;  %v613_v34 = vadd.f32 %v612_v28, %v195_v30 }
 0x142   :  { %v852_v23 = vmul.f32 -1.442695, %v572_v21  ;;  %v574_v24 = vadd.f32 %v573_v22, %v191_v19  ;;  %v614_v31 = vpop.f32.mrf.mxu1 }
 0x143   :  { %v575_v26 = vpop.f32.mrf.mxu0  ;;  %v854_v37 = vmul.f32 -1.442695, %v613_v34  ;;  %v615_v38 = vadd.f32 %v614_v31, %v199_v36 }
 0x144   :  { %1010 = vpow2.f32 %v852_v23  ;;  %v853_v27 = vmul.f32 -1.442695, %v574_v24  ;;  %v616_v33 = vpop.f32.mrf.mxu1 }
 0x145   :  { %v576_v29 = vpop.f32.mrf.mxu0 }
 0x146   :  { %1012 = vpow2.f32 %v853_v27  ;;  %v617_v35 = vpop.f32.mrf.mxu1 }
 0x147   :  { %1014 = vpow2.f32 %v854_v37 }
 0x148   :  { %1016 = vtanh.f32 %v615_v38 }
 0x151   :  { %v1011_v39 = vpop.eup %1010 }
 0x152   :  { %v628_v40 = vadd.f32 1.0, %v1011_v39 }
 0x153   :  { %v1013_v41 = vpop.eup %1012 }
 0x154   :  { %1018 = vrcp.f32 %v628_v40  ;;  %v629_v42 = vadd.f32 1.0, %v1013_v41  ;;  %v1015_v43 = vpop.eup %1014 }
 0x155   :  { %v1017_v44 = vpop.eup %1016  ;;  %v630_v48 = vadd.f32 1.0, %v1015_v43 }
 0x156   :  { %1020 = vrcp.f32 %v629_v42 }
 0x157   :  { %1022 = vrcp.f32 %v630_v48 }
 0x161   :  { %v1019_v45 = vpop.eup %1018 }
 0x162   :  { %v640_v50 = vmul.f32 %v1019_v45, %v1017_v44 }
 0x163   :  { %v1021_v47 = vpop.eup %1020 }
 0x164   :  { %v639_v49 = vmul.f32 %v1021_v47, %v100_v46  ;;  %v1023_v52 = vpop.eup %1022 }
 0x166   :  { %v641_v51 = vadd.f32 %v640_v50, %v639_v49 }
 0x168   :  { %1024 = vtanh.f32 %v641_v51  ;;  %742 = vst [vmem:[#allocation16] sm:$0xff] %v641_v51 }
 0x175   :  { %v1025_v53 = vpop.eup %1024 }
 0x176   :  { %v643_v54 = vmul.f32 %v1025_v53, %v1023_v52 }
 0x178   :  { %v646_v55 = vpack.c.bf16 %v643_v54, %v643_v54  ;;  %740 = vst [vmem:[#allocation14] sm:$0xff] %v643_v54 }
 0x17a   :  { %889 = vmatmul.mubr.bf16.vlgmr.msra.gmra.mxu0 %v646_v55 }
 0x17b   :  { %1137 = shalt.err (!%p1134_p1)
}
 0x17c   :  { %762 = dma.vmem_to_hbm [thread:$0]  %s760_s14, 128, %s1298_s8, [#allocation15]  }
 0x17d   :  { %s1208_s18 = smov [#allocation16]  }
 0x17e   :  { %s769_s19 = sshll.u32 %s1208_s18, 4  ;;  %s770_s19 = int_to_ptr.vmem [resolvable:$true] %s769_s19 }
 0x17f   :  { %s1146_s20 = scalar_lea.vmem %s770_s19, 128  ;;  %p1151_p3 = scmp.lt.s32.totalorder %s770_s19, %s770_s19 }
 0x180   :  { %p1147_p2 = scmp.ne.s32.totalorder %s770_s19, %s1146_s20  ;;  %p1152_p4 = scmp.lt.s32.totalorder %s1146_s20, %s1146_s20 }
 0x182   :  { %p1153_p5 = por %p1152_p4, %p1151_p3 }
 0x184   :  { %p1154_p6 = pnand %p1153_p5, %p1147_p2 }
 0x186   :  { %1157 = shalt.err (!%p1154_p6)
}
 0x187   :  { %772 = dma.vmem_to_hbm [thread:$0]  %s770_s19, 128, %s1299_s9, [#allocation15]   ;;  %v787_v56 = vld [vmem:[%s1296_s6] ss:$0 sm:$0xff] }
 0x188   :  { %s1209_s1 = smov [#allocation13]  }
 0x189   :  { %s749_s8 = sshll.u32 %s1209_s1, 4  ;;  %s750_s8 = int_to_ptr.vmem [resolvable:$true] %s749_s8 }
 0x18a   :  { %s1166_s25 = scalar_lea.vmem %s750_s8, 128  ;;  %p1171_p8 = scmp.lt.s32.totalorder %s750_s8, %s750_s8 }
 0x18b   :  { %p1167_p7 = scmp.ne.s32.totalorder %s750_s8, %s1166_s25  ;;  %p1172_p9 = scmp.lt.s32.totalorder %s1166_s25, %s1166_s25 }
 0x18d   :  { %p1173_p10 = por %p1172_p9, %p1171_p8 }
 0x18f   :  { %p1174_p11 = pnand %p1173_p10, %p1167_p7 }
 0x23a   :  { %v729_v57 = vpop.f32.mrf.mxu0 }
 0x23b   :  { %v730_v58 = vadd.f32 %v787_v56, %v729_v57 }
 0x23c   :  { %v890_v59 = vpop.f32.mrf.mxu0 }
 0x23d   :  { %735 = vst [vmem:[#allocation13] sm:$0xff] %v730_v58 }
 0x23e   :  { %v732_v60 = vpop.f32.mrf.mxu0 }
 0x23f   :  { %1177 = shalt.err (!%p1174_p11)
}
 0x240   :  { %752 = dma.vmem_to_hbm [thread:$0]  %s750_s8, 128, %s1297_s7, [#allocation6]   ;;  %v891_v61 = vpop.f32.mrf.mxu0 }
 0x241   :  { %1192 = dma.done.wait [#allocation6], 128  }
 0x242   :  { %1193 = vsyncadd [#allocation6], 4294967168 }
 0x243   :  { %1194 = dma.done.wait [#allocation15], 256  }
 0x244   :  { %1195 = vsyncadd [#allocation15], 4294967040 }
 0x245   :  { %782 = vsyncpa [#allocation5], 1 }
 0x246   :  { %783 = vsyncpa [#allocation8], 1 }
 0x247   :  { %784 = vsyncpa [#allocation11], 1 }
 0x248   :  { %785 = vsyncpa [#allocation6], 1 }
 0x249   :  { %786 = vsyncpa [#allocation15], 1 }

</bundles_post_ra>
